<compile_context>
chip_gen: v7x
topology: tpu7x:2x2x1
jax: 0.10.0
libtpu: 0.0.40
codegen_flags: <defaults>
</compile_context>

<pallas_src>
import functools

import jax
import jax.numpy as jnp
from jax.experimental import pallas as pl
from jax.experimental.pallas import tpu as pltpu

LANE = 128  # TPU lane width; output dim is padded to a multiple of this.


def mlp_kernel(x_ref, w1_ref, b1_ref, w2_ref, b2_ref, out_ref):
    # Fused: hidden = relu(x @ W1 + b1); out = hidden @ W2pad + b2pad
    x = x_ref[...]                                              # (TB, obs)
    h = jnp.dot(x, w1_ref[...], preferred_element_type=jnp.float32)
    h = jnp.maximum(h + b1_ref[...], 0.0)                       # bias + ReLU in f32
    y = jnp.dot(h, w2_ref[...], preferred_element_type=jnp.float32)
    out_ref[...] = (y + b2_ref[...]).astype(out_ref.dtype)      # (TB, 128) lane-dense


def pad_output_layer(w2, b2, lane=LANE):
    """Zero-pad (H, A)/(1, A) -> (H, Ap)/(1, Ap) with Ap a multiple of 128.

    Padded columns are exactly zero, so the first A logits are unchanged.
    """
    H, A = w2.shape
    a_pad = max(lane, pl.cdiv(A, lane) * lane)
    w2p = jnp.zeros((H, a_pad), w2.dtype).at[:, :A].set(w2)
    b2p = jnp.zeros((1, a_pad), b2.dtype).at[:, :A].set(b2)
    return w2p, b2p


@functools.partial(jax.jit, static_argnames=("n_actions", "tb"))
def net_forward(x, w1, b1, w2p, b2p, *, n_actions, tb=256):
    """x: (B, obs), w1: (obs, H), b1: (1, H), w2p: (H, 128k), b2p: (1, 128k).

    Returns (B, n_actions) logits.
    """
    B, obs = x.shape
    H = w1.shape[1]
    Ap = w2p.shape[1]

    if B <= tb:
        # Small batch: gridless single-block call, everything lives in VMEM.
        out_p = pl.pallas_call(
            mlp_kernel,
            out_shape=jax.ShapeDtypeStruct((B, Ap), jnp.float32),
            in_specs=[pl.BlockSpec(memory_space=pltpu.MemorySpace.VMEM)] * 5,
            out_specs=pl.BlockSpec(memory_space=pltpu.MemorySpace.VMEM),
        )(x, w1, b1, w2p, b2p)
    else:
        # Large batch: tile only the batch axis; weights/biases use a constant
        # block index so they are DMA'd once and stay resident across steps.
        nb = pl.cdiv(B, tb)
        b_pad = nb * tb
        if b_pad != B:
            x = jnp.pad(x, ((0, b_pad - B), (0, 0)))
        out_p = pl.pallas_call(
            mlp_kernel,
            out_shape=jax.ShapeDtypeStruct((b_pad, Ap), jnp.float32),
            grid=(nb,),
            in_specs=[
                pl.BlockSpec((tb, obs), lambda i: (i, 0)),   # x: batch-tiled
                pl.BlockSpec((obs, H), lambda i: (0, 0)),    # W1: resident
                pl.BlockSpec((1, H), lambda i: (0, 0)),      # b1: resident
                pl.BlockSpec((H, Ap), lambda i: (0, 0)),     # W2 (padded): resident
                pl.BlockSpec((1, Ap), lambda i: (0, 0)),     # b2 (padded): resident
            ],
            out_specs=pl.BlockSpec((tb, Ap), lambda i: (i, 0)),
            compiler_params=pltpu.CompilerParams(
                # Independent batch tiles -> shard across both v7x TensorCores.
                dimension_semantics=("parallel",),
            ),
        )(x, w1, b1, w2p, b2p)

    return out_p[:B, :n_actions]


def init_params(key, obs_size, hidden_size, n_actions):
    """Deterministic synthetic init matching PyTorch Linear shapes.

    PyTorch: Linear(obs, hidden).weight is (hidden, obs); we store the
    transpose (obs, hidden) so the kernel does x @ W.
    """
    k1, k2, k3, k4 = jax.random.split(key, 4)
    s1 = 1.0 / jnp.sqrt(obs_size)
    s2 = 1.0 / jnp.sqrt(hidden_size)
    w1 = jax.random.uniform(k1, (obs_size, hidden_size), jnp.float32, -s1, s1)
    b1 = jax.random.uniform(k2, (1, hidden_size), jnp.float32, -s1, s1)
    w2 = jax.random.uniform(k3, (hidden_size, n_actions), jnp.float32, -s2, s2)
    b2 = jax.random.uniform(k4, (1, n_actions), jnp.float32, -s2, s2)
    return w1, b1, w2, b2


def reference(x, w1, b1, w2, b2):
    return jnp.maximum(x @ w1 + b1, 0.0) @ w2 + b2


if __name__ == "__main__":
    # CartPole-like sizes: obs_size=4, hidden_size=128, n_actions=2
    obs_size, hidden_size, n_actions = 4, 128, 2

    key = jax.random.PRNGKey(0)
    kx1, kx2, kp = jax.random.split(key, 3)
    w1, b1, w2, b2 = init_params(kp, obs_size, hidden_size, n_actions)
    w2p, b2p = pad_output_layer(w2, b2)   # lane-dense second layer (zero-padded)

    # --- Path 1: tiny acting batch -> gridless whole-block call ------------
    batch_small = 8
    x_small = jax.random.normal(kx1, (batch_small, obs_size), jnp.float32)
    out_small = net_forward(x_small, w1, b1, w2p, b2p, n_actions=n_actions)
    out_small = jax.block_until_ready(out_small)
    ref_small = reference(x_small, w1, b1, w2, b2)
    assert out_small.shape == (batch_small, n_actions)
    assert jnp.allclose(out_small, ref_small, atol=1e-4, rtol=1e-4)

    # --- Path 2: rollout-sized batch -> batch-tiled grid (parallel axis) ---
    batch_big = 1000   # deliberately not a multiple of the tile; wrapper pads
    x_big = jax.random.normal(kx2, (batch_big, obs_size), jnp.float32)
    out_big = net_forward(x_big, w1, b1, w2p, b2p, n_actions=n_actions, tb=256)
    out_big = jax.block_until_ready(out_big)
    ref_big = reference(x_big, w1, b1, w2, b2)
    assert out_big.shape == (batch_big, n_actions)
    assert jnp.allclose(out_big, ref_big, atol=1e-4, rtol=1e-4)

    print("KERNEL_OK")
</pallas_src>

<mosaic_0001>
module attributes {stable_mosaic.version = 11 : i64} {
  func.func @mlp_kernel(%arg0: memref<8x4xf32, #tpu.memory_space<vmem>>, %arg1: memref<4x128xf32, #tpu.memory_space<vmem>>, %arg2: memref<1x128xf32, #tpu.memory_space<vmem>>, %arg3: memref<128x128xf32, #tpu.memory_space<vmem>>, %arg4: memref<1x128xf32, #tpu.memory_space<vmem>>, %arg5: memref<8x128xf32, #tpu.memory_space<vmem>>) attributes {dimension_semantics = [], scalar_prefetch = 0 : i64, scratch_operands = 0 : i64, tpu.core_type = #tpu.core_type<tc>} {
    %c0 = arith.constant 0 : index
    %c0_0 = arith.constant 0 : index
    %0 = vector.load %arg0[%c0, %c0_0] : memref<8x4xf32, #tpu.memory_space<vmem>>, vector<8x4xf32>
    %c0_1 = arith.constant 0 : index
    %c0_2 = arith.constant 0 : index
    %1 = vector.load %arg1[%c0_1, %c0_2] : memref<4x128xf32, #tpu.memory_space<vmem>>, vector<4x128xf32>
    %cst = arith.constant dense<0.000000e+00> : vector<8x128xf32>
    %2 = tpu.matmul %0, %1, %cst {dimension_numbers = #tpu.dot_dimension_numbers<[1], [0], [0], [1], [0, 0, 1, 1], [], []>} : vector<8x4xf32>, vector<4x128xf32>, vector<8x128xf32> -> vector<8x128xf32>
    %c0_3 = arith.constant 0 : index
    %c0_4 = arith.constant 0 : index
    %3 = vector.load %arg2[%c0_3, %c0_4] : memref<1x128xf32, #tpu.memory_space<vmem>>, vector<1x128xf32>
    %4 = vector.broadcast %3 : vector<1x128xf32> to vector<8x128xf32>
    %5 = arith.addf %2, %4 : vector<8x128xf32>
    %cst_5 = arith.constant 0.000000e+00 : f32
    %6 = vector.broadcast %cst_5 : f32 to vector<8x128xf32>
    %7 = arith.maximumf %5, %6 : vector<8x128xf32>
    %c0_6 = arith.constant 0 : index
    %c0_7 = arith.constant 0 : index
    %8 = vector.load %arg3[%c0_6, %c0_7] : memref<128x128xf32, #tpu.memory_space<vmem>>, vector<128x128xf32>
    %cst_8 = arith.constant dense<0.000000e+00> : vector<8x128xf32>
    %9 = tpu.matmul %7, %8, %cst_8 {dimension_numbers = #tpu.dot_dimension_numbers<[1], [0], [0], [1], [0, 0, 1, 1], [], []>} : vector<8x128xf32>, vector<128x128xf32>, vector<8x128xf32> -> vector<8x128xf32>
    %c0_9 = arith.constant 0 : index
    %c0_10 = arith.constant 0 : index
    %10 = vector.load %arg4[%c0_9, %c0_10] : memref<1x128xf32, #tpu.memory_space<vmem>>, vector<1x128xf32>
    %11 = vector.broadcast %10 : vector<1x128xf32> to vector<8x128xf32>
    %12 = arith.addf %9, %11 : vector<8x128xf32>
    %c0_11 = arith.constant 0 : index
    %c0_12 = arith.constant 0 : index
    %13 = vector.load %arg5[%c0_11, %c0_12] : memref<8x128xf32, #tpu.memory_space<vmem>>, vector<8x128xf32>
    tpu.vector_store %arg5[%c0_11, %c0_12], %12 {strides = array<i32>} : memref<8x128xf32, #tpu.memory_space<vmem>>, vector<8x128xf32>,
    return
  }
}

</mosaic_0001>

<bundles_post_ra>
// kernel: net_forward.1
= control target key start
LH: loop header
LB: loop body
LE: loop exit
PB: predicated region body
PF: predicated region fallthrough
CT: control target
= control target key end

     0   :  { %10 = vsyncpa [#allocation3], 0  ;;  %s338_s18 = smov [#allocation2]   ;;  %s401_s0 = inlined_call_operand.vmem [shape: f32[8,4], index: 0, kind: input, shape index: {}]   ;;  %s402_s1 = inlined_call_operand.vmem [shape: f32[4,128], index: 1, kind: input, shape index: {}]   ;;  %s403_s2 = inlined_call_operand.vmem [shape: f32[1,128], index: 2, kind: input, shape index: {}]   ;;  %s404_s3 = inlined_call_operand.hbm [shape: f32[128,128], index: 3, kind: input, shape index: {}]   ;;  %s405_s4 = inlined_call_operand.vmem [shape: f32[1,128], index: 4, kind: input, shape index: {}]   ;;  %s406_s5 = inlined_call_operand.vmem [shape: f32[8,128], index: 5, kind: output, shape index: {}]  }
   0x1   :  { %s22_s19 = sshll.u32 %s338_s18, 4  ;;  %s314_s22 = scalar_lea.hbm %s404_s3, 2048  ;;  %s23_s19 = int_to_ptr.vmem [resolvable:$true] %s22_s19 }
   0x2   :  { %p315_p0 = scmp.ne.s32.totalorder %s404_s3, %s314_s22  ;;  %p318_p1 = scmp.lt.u32.totalorder %s314_s22, %s404_s3 }
   0x4   :  { %p320_p2 = pnand %p318_p1, %p315_p0 }
   0x6   :  { %323 = shalt.err (!%p320_p2)
}
   0x7   :  { %s324_s27 = scalar_lea.vmem %s23_s19, 2048  ;;  %p329_p4 = scmp.lt.s32.totalorder %s23_s19, %s23_s19 }
   0x8   :  { %p325_p3 = scmp.ne.s32.totalorder %s23_s19, %s324_s27  ;;  %p330_p5 = scmp.lt.s32.totalorder %s324_s27, %s324_s27 }
   0xa   :  { %p331_p6 = por %p330_p5, %p329_p4 }
   0xc   :  { %p332_p7 = pnand %p331_p6, %p325_p3 }
   0xe   :  { %335 = shalt.err (!%p332_p7)
}
   0xf   :  { %s339_s28 = smov 128   ;;  %s340_s29 = smov 8  }
  0x10   :  { %28 = dma.hbm_to_vmem [thread:$0]  %s404_s3, 2048, %s23_s19, [#allocation3], %s339_s28, %s339_s28, %s340_s29  }
  0x11   :  { %336 = dma.done.wait [#allocation3], 2048  }
  0x12   :  { %337 = vsyncadd [#allocation3], 4294965248  ;;  %v341_v0 = vmov 0.0   ;;  %vm342_vm0 = vmmov 0   ;;  %v343_v1 = vmov 0.0|0.0   ;;  %vm47_vm1 = vcmask 1043456  }
  0x13   :  { %244 = vmatprep.subr.mxu0 %v341_v0  ;;  %246 = vmatprep.mubr.msk.f32.mxu0 %vm342_vm0, %v341_v0  ;;  %vm43_vm2 = vcmask 31744   ;;  %v35_v2 = vld [vmem:[%s402_s1] sm:$0xf]  ;;  %v123_v5 = vld [vmem:[#allocation2 + $0x8] sm:$0xff]  ;;  %v124_v6 = vld [vmem:[#allocation2 + $0x10] sm:$0xff] }
  0x14   :  { %284 = vmatprep.subr.bf16.mxu1 %v343_v1  ;;  %281 = vmatprep.mubr.msk.f32.mxu1 %vm342_vm0, %v341_v0  ;;  %v34_v3 = vld [vmem:[%s401_s0] sm:$0xff]  ;;  %v125_v7 = vld [vmem:[#allocation2 + $0x18] sm:$0xff]  ;;  %v127_v11 = vld [vmem:[#allocation2 + $0x28] sm:$0xff] }
  0x15   :  { %v122_v4 = vld [vmem:[#allocation2] sm:$0xff]  ;;  %245 = vmatpush3.msk.msra.mxu0 %vm47_vm1, %v35_v2  ;;  %v288_v9 = vpack.c.bf16 %v125_v7, %v124_v6  ;;  %v128_v13 = vld [vmem:[#allocation2 + $0x30] sm:$0xff]  ;;  %v129_v14 = vld [vmem:[#allocation2 + $0x38] sm:$0xff] }
  0x16   :  { %247 = vmatmul.mubr.msk.f32.vlgmr.msra.gmra.mrb[0].mxu0 %vm43_vm2, %v34_v3  ;;  %v285_v8 = vpack.c.bf16 %v123_v5, %v122_v4  ;;  %v126_v10 = vld [vmem:[#allocation2 + $0x20] sm:$0xff]  ;;  %v294_v15 = vpack.c.bf16 %v129_v14, %v128_v13  ;;  %v131_v17 = vld [vmem:[#allocation2 + $0x48] sm:$0xff]  ;;  %v132_v19 = vld [vmem:[#allocation2 + $0x50] sm:$0xff] }
  0x17   :  { %v291_v12 = vpack.c.bf16 %v127_v11, %v126_v10  ;;  %v130_v16 = vld [vmem:[#allocation2 + $0x40] sm:$0xff]  ;;  %v133_v20 = vld [vmem:[#allocation2 + $0x58] sm:$0xff]  ;;  %v135_v23 = vld [vmem:[#allocation2 + $0x68] sm:$0xff] }
  0x18   :  { %286 = vmatpush3.bf16.msra.mxu1 %v285_v8  ;;  %v297_v18 = vpack.c.bf16 %v131_v17, %v130_v16  ;;  %v300_v21 = vpack.c.bf16 %v133_v20, %v132_v19  ;;  %v134_v22 = vld [vmem:[#allocation2 + $0x60] sm:$0xff]  ;;  %v136_v25 = vld [vmem:[#allocation2 + $0x70] sm:$0xff]  ;;  %v137_v26 = vld [vmem:[#allocation2 + $0x78] sm:$0xff] }
  0x19   :  { %287 = vmatprep.subr.bf16.mxu1 %v343_v1  ;;  %v303_v24 = vpack.c.bf16 %v135_v23, %v134_v22  ;;  %v306_v27 = vpack.c.bf16 %v137_v26, %v136_v25  ;;  %v221_v28 = vld [vmem:[%s403_s2] ss:$0 sm:$0xff] }
  0x1a   :  { %v224_v33 = vld [vmem:[%s405_s4] ss:$0 sm:$0xff] }
  0x1c   :  { %289 = vmatpush3.bf16.msra.mxu1 %v288_v9 }
  0x1d   :  { %290 = vmatprep.subr.bf16.mxu1 %v343_v1 }
  0x20   :  { %292 = vmatpush3.bf16.msra.mxu1 %v291_v12 }
  0x21   :  { %293 = vmatprep.subr.bf16.mxu1 %v343_v1 }
  0x24   :  { %295 = vmatpush3.bf16.msra.mxu1 %v294_v15 }
  0x25   :  { %296 = vmatprep.subr.bf16.mxu1 %v343_v1 }
  0x28   :  { %298 = vmatpush3.bf16.msra.mxu1 %v297_v18 }
  0x29   :  { %299 = vmatprep.subr.bf16.mxu1 %v343_v1 }
  0x2c   :  { %301 = vmatpush3.bf16.msra.mxu1 %v300_v21 }
  0x2d   :  { %302 = vmatprep.subr.bf16.mxu1 %v343_v1 }
  0x30   :  { %304 = vmatpush3.bf16.msra.mxu1 %v303_v24 }
  0x31   :  { %305 = vmatprep.subr.bf16.mxu1 %v343_v1 }
  0x34   :  { %307 = vmatpush3.bf16.msra.mxu1 %v306_v27 }
  0xe9   :  { %v117_v29 = vpop.f32.mrb[0].mxu0 }
  0xea   :  { %v118_v30 = vadd.f32 %v221_v28, %v117_v29  ;;  %v248_v31 = vpop.f32.mrb[1].mxu0 }
  0xec   :  { %v121_v32 = vmax.f32 %v118_v30, 0.0 }
  0xee   :  { %282 = vmatmul.mubr.f32.vlgmr.msra.gmra.mrb[0].mxu1 %v121_v32 }
 0x1c1   :  { %v211_v34 = vpop.f32.mrb[0].mxu1 }
 0x1c2   :  { %v212_v35 = vadd.f32 %v224_v33, %v211_v34  ;;  %v283_v36 = vpop.f32.mrb[1].mxu1 }
 0x1c4   :  { %215 = vst [vmem:[%s406_s5] sm:$0xff] %v212_v35 }
 0x1c5   :  { %220 = vsyncpa [#allocation3], 1 }

</bundles_post_ra>
